<compile_context>
chip_gen: v7x
topology: tpu7x:2x2x1
jax: 0.10.0
libtpu: 0.0.40
codegen_flags: <defaults>
</compile_context>

<pallas_src>
import math

import jax
import jax.numpy as jnp
from jax import lax
from jax.experimental import pallas as pl
from jax.experimental.pallas import tpu as pltpu


def _round_up(x, m):
    return ((x + m - 1) // m) * m


# ----------------------------------------------------------------------------
# Single-cell kernel: exactly the PyTorch module forward (one (x, h) pair).
# fused = [i2h | i2o](cat(x, h)) computed without the concat:
#   x @ Wx + h @ Wh + b   -> [B_pad, H_pad + O_pad], f32 MXU accumulation.
# ----------------------------------------------------------------------------
def _make_cell_kernel(o_valid):
    def kernel(x_ref, h_ref, wx_ref, wh_ref, b_ref, out_ref, hid_ref):
        h_pad = hid_ref.shape[1]
        fused = (jnp.dot(x_ref[...], wx_ref[...],
                         preferred_element_type=jnp.float32)
                 + jnp.dot(h_ref[...], wh_ref[...],
                           preferred_element_type=jnp.float32)
                 + b_ref[...])

        # Lane-aligned slices (H_pad, O_pad are multiples of 128).
        hid_ref[...] = fused[:, :h_pad].astype(hid_ref.dtype)

        logits = fused[:, h_pad:]
        col = lax.broadcasted_iota(jnp.int32, logits.shape, 1)
        masked = jnp.where(col < o_valid, logits, -jnp.inf)
        m = jnp.max(masked, axis=1, keepdims=True)
        shifted = masked - m
        lse = jnp.log(jnp.sum(jnp.exp(shifted), axis=1, keepdims=True))
        out_ref[...] = (shifted - lse).astype(out_ref.dtype)
    return kernel


def rnn_cell_forward(x, h, params):
    """Matches the PyTorch RNN.forward: x [B, I], h [B, H] ->
    (log_probs [B, O], new_hidden [B, H])."""
    wx, wh, b = params["wx"], params["wh"], params["b"]
    H, O = params["hidden_size"], params["output_size"]
    H_pad, HO_pad = wh.shape
    O_pad = HO_pad - H_pad
    B, I = x.shape
    B_pad = _round_up(max(B, 8), 8)

    xp = jnp.pad(x, ((0, B_pad - B), (0, 0)))
    hp = jnp.pad(h, ((0, B_pad - B), (0, H_pad - H)))

    full = lambda shape: pl.BlockSpec(shape, lambda i: (0,) * len(shape))

    out_p, hid_p = pl.pallas_call(
        _make_cell_kernel(O),
        out_shape=(jax.ShapeDtypeStruct((B_pad, O_pad), x.dtype),
                   jax.ShapeDtypeStruct((B_pad, H_pad), x.dtype)),
        grid=(1,),
        in_specs=[full((B_pad, I)), full((B_pad, H_pad)), full(wx.shape),
                  full(wh.shape), full(b.shape)],
        out_specs=(full((B_pad, O_pad)), full((B_pad, H_pad))),
        compiler_params=pltpu.CompilerParams(
            dimension_semantics=("arbitrary",)),
    )(xp, hp, wx, wh, b)

    return out_p[:B, :O], hid_p[:B, :H]


# ----------------------------------------------------------------------------
# Hoisted input projection (no serial dependence): tiled GEMM over row chunks,
# bias folded in so the recurrence never touches it.
# ----------------------------------------------------------------------------
def _input_proj_kernel(x_ref, wx_ref, b_ref, o_ref):
    o_ref[...] = (jnp.dot(x_ref[...], wx_ref[...],
                          preferred_element_type=jnp.float32)
                  + b_ref[...]).astype(o_ref.dtype)


def input_projection(x_flat, wx, b, *, tile_rows):
    """x_flat [N, I] @ wx [I, HO_pad] + b -> [N, HO_pad] (f32), tiled over rows."""
    N, I = x_flat.shape
    HO = wx.shape[1]
    assert N % tile_rows == 0
    return pl.pallas_call(
        _input_proj_kernel,
        out_shape=jax.ShapeDtypeStruct((N, HO), jnp.float32),
        grid=(N // tile_rows,),
        in_specs=[pl.BlockSpec((tile_rows, I), lambda i: (i, 0)),
                  pl.BlockSpec((I, HO), lambda i: (0, 0)),
                  pl.BlockSpec((1, HO), lambda i: (0, 0))],
        out_specs=pl.BlockSpec((tile_rows, HO), lambda i: (i, 0)),
        compiler_params=pltpu.CompilerParams(
            dimension_semantics=("parallel",)),
    )(x_flat, wx, b)


# ----------------------------------------------------------------------------
# Fused-sequence kernel: whole recurrence in one pallas_call, chunked over T.
# Weights resident (constant index_map); hidden carried in vregs inside a chunk
# and in VMEM scratch across chunks; epilogue only on the final chunk.
# ----------------------------------------------------------------------------
def rnn_sequence_forward(xs, h0, params, *, chunk=4):
    """xs: [T, B, I], h0: [B, H].  Applies the module's cell T times and
    returns (final log_probs [B, O], final hidden [B, H])."""
    wx, wh, b = params["wx"], params["wh"], params["b"]
    H, O = params["hidden_size"], params["output_size"]
    H_pad, HO_pad = wh.shape
    O_pad = HO_pad - H_pad

    T, B, I = xs.shape
    B_pad = _round_up(max(B, 8), 8)
    Tc = min(chunk, T)
    assert T % Tc == 0, "sequence length must be divisible by the time chunk"

    xs_p = jnp.pad(xs, ((0, 0), (0, B_pad - B), (0, 0)))
    h0_p = jnp.pad(h0, ((0, B_pad - B), (0, H_pad - H)))

    # Hoist the input-dependent half (+ bias) out of the recurrence.
    xproj = input_projection(
        xs_p.reshape(T * B_pad, I), wx, b, tile_rows=Tc * B_pad
    ).reshape(T, B_pad, HO_pad)

    def seq_kernel(xproj_ref, h0_ref, wh_ref, out_ref, hid_ref, h_scr):
        c = pl.program_id(0)
        tc = xproj_ref.shape[0]
        h_pad = h_scr.shape[1]

        @pl.when(c == 0)
        def _():
            h_scr[...] = h0_ref[...].astype(jnp.float32)

        wh_v = wh_ref[...]                       # resident weight, loaded once
        h_init = h_scr[...]                      # carry enters vregs here
        logits_init = jnp.zeros((h_init.shape[0], out_ref.shape[1]),
                                jnp.float32)

        def step(t, carry):
            h, _ = carry
            fused = xproj_ref[t] + jnp.dot(h, wh_v,
                                           preferred_element_type=jnp.float32)
            # Lane-aligned slices: hidden / logits halves of the fused output.
            return fused[:, :h_pad], fused[:, h_pad:]

        h_fin, logits = lax.fori_loop(0, tc, step, (h_init, logits_init),
                                      unroll=True)
        h_scr[...] = h_fin                       # carry across chunks

        @pl.when(c == pl.num_programs(0) - 1)
        def _():
            hid_ref[...] = h_fin.astype(hid_ref.dtype)
            col = lax.broadcasted_iota(jnp.int32, logits.shape, 1)
            masked = jnp.where(col < O, logits, -jnp.inf)   # mask padded cols
            m = jnp.max(masked, axis=1, keepdims=True)
            shifted = masked - m
            lse = jnp.log(jnp.sum(jnp.exp(shifted), axis=1, keepdims=True))
            out_ref[...] = (shifted - lse).astype(out_ref.dtype)

    out_p, hid_p = pl.pallas_call(
        seq_kernel,
        out_shape=(jax.ShapeDtypeStruct((B_pad, O_pad), xs.dtype),
                   jax.ShapeDtypeStruct((B_pad, H_pad), xs.dtype)),
        grid=(T // Tc,),
        in_specs=[
            pl.BlockSpec((Tc, B_pad, HO_pad), lambda c: (c, 0, 0)),  # xproj chunk
            pl.BlockSpec((B_pad, H_pad), lambda c: (0, 0)),          # h0 (resident)
            pl.BlockSpec((H_pad, HO_pad), lambda c: (0, 0)),         # Wh (resident)
        ],
        out_specs=(pl.BlockSpec((B_pad, O_pad), lambda c: (0, 0)),
                   pl.BlockSpec((B_pad, H_pad), lambda c: (0, 0))),
        scratch_shapes=[pltpu.VMEM((B_pad, H_pad), jnp.float32)],   # hidden carry
        compiler_params=pltpu.CompilerParams(
            dimension_semantics=("arbitrary",)),
    )(xproj, h0_p, wh)

    return out_p[:B, :O], hid_p[:B, :H]


# ----------------------------------------------------------------------------
# Parameter init (PyTorch nn.Linear default: U(-1/sqrt(fan_in)), fan_in = I+H).
# Stored fused ([i2h | i2o]), pre-transposed to (in_features, out_features),
# split into the x-half and h-half, and zero-padded to the lane-aligned layout:
#   columns [0, H)            -> hidden        (padded up to H_pad = ceil128(H))
#   columns [H_pad, H_pad+O)  -> logits        (padded up to O_pad = ceil128(O))
# Padded hidden columns / Wh rows are zero, so the padded recurrence is exact.
# ----------------------------------------------------------------------------
def init_rnn_params(key, input_size, hidden_size, output_size,
                    dtype=jnp.float32):
    I, H, O = input_size, hidden_size, output_size
    H_pad = _round_up(H, 128)
    O_pad = _round_up(O, 128)
    bound = 1.0 / math.sqrt(I + H)
    kx, kh, kb = jax.random.split(key, 3)

    wx_raw = jax.random.uniform(kx, (I, H + O), minval=-bound, maxval=bound,
                                dtype=dtype)
    wh_raw = jax.random.uniform(kh, (H, H + O), minval=-bound, maxval=bound,
                                dtype=dtype)
    b_raw = jax.random.uniform(kb, (1, H + O), minval=-bound, maxval=bound,
                               dtype=dtype)

    def pad_fused(w_raw, rows_pad):
        rows = w_raw.shape[0]
        w = jnp.zeros((rows_pad, H_pad + O_pad), dtype)
        w = w.at[:rows, :H].set(w_raw[:, :H])
        w = w.at[:rows, H_pad:H_pad + O].set(w_raw[:, H:])
        return w

    return dict(
        wx=pad_fused(wx_raw, I),
        wh=pad_fused(wh_raw, H_pad),
        b=pad_fused(b_raw, 1),
        hidden_size=H,
        output_size=O,
        wx_raw=wx_raw,
        wh_raw=wh_raw,
        b_raw=b_raw,
    )


if __name__ == "__main__":
    batch = 2
    input_size = 16
    hidden_size = 32
    output_size = 8
    seq_len = 8

    key = jax.random.PRNGKey(0)
    k_x, k_seq, k_p = jax.random.split(key, 3)

    x = jax.random.normal(k_x, (batch, input_size), dtype=jnp.float32)
    xs = jax.random.normal(k_seq, (seq_len, batch, input_size),
                           dtype=jnp.float32)
    h0 = jnp.zeros((batch, hidden_size), dtype=jnp.float32)  # init_hidden()

    params = init_rnn_params(k_p, input_size, hidden_size, output_size)
    wx_raw, wh_raw, b_raw = params["wx_raw"], params["wh_raw"], params["b_raw"]

    # Pure-JAX reference of the module's cell (mathematically identical to
    # i2h/i2o applied to cat(x, h)).
    def ref_cell(h, xi):
        fused = xi @ wx_raw + h @ wh_raw + b_raw
        hid = fused[:, :hidden_size]
        logp = jax.nn.log_softmax(fused[:, hidden_size:], axis=1)
        return hid, logp

    # --- single-cell forward (matches RNN.forward exactly) -------------------
    log_probs, new_hidden = rnn_cell_forward(x, h0, params)
    jax.block_until_ready((log_probs, new_hidden))
    ref_hid, ref_logp = ref_cell(h0, x)
    assert jnp.allclose(new_hidden, ref_hid, atol=1e-4, rtol=1e-4), \
        "hidden mismatch"
    assert jnp.allclose(log_probs, ref_logp, atol=1e-4, rtol=1e-4), \
        "logsoftmax mismatch"

    # --- fused multi-step recurrence (chunked grid over the sequence) --------
    seq_log_probs, seq_hidden = rnn_sequence_forward(xs, h0, params, chunk=4)
    jax.block_until_ready((seq_log_probs, seq_hidden))

    ref_final_hid, ref_logps = lax.scan(lambda h, xi: ref_cell(h, xi), h0, xs)
    assert jnp.allclose(seq_hidden, ref_final_hid, atol=1e-4, rtol=1e-4), \
        "sequence hidden mismatch"
    assert jnp.allclose(seq_log_probs, ref_logps[-1], atol=1e-4, rtol=1e-4), \
        "sequence logsoftmax mismatch"

    print("KERNEL_OK")
</pallas_src>

<mosaic_0001>
module attributes {stable_mosaic.version = 11 : i64} {
  func.func @kernel(%arg0: i32, %arg1: memref<8x16xf32, #tpu.memory_space<vmem>>, %arg2: memref<8x128xf32, #tpu.memory_space<vmem>>, %arg3: memref<16x256xf32, #tpu.memory_space<vmem>>, %arg4: memref<128x256xf32, #tpu.memory_space<vmem>>, %arg5: memref<1x256xf32, #tpu.memory_space<vmem>>, %arg6: memref<8x128xf32, #tpu.memory_space<vmem>>, %arg7: memref<8x128xf32, #tpu.memory_space<vmem>>) attributes {dimension_semantics = [#tpu.dimension_semantics<arbitrary>], iteration_bounds = array<i64: 1>, scalar_prefetch = 0 : i64, scratch_operands = 0 : i64, tpu.core_type = #tpu.core_type<tc>, window_params = [{pipeline_mode = #tpu.pipeline_mode<synchronous>, transform_indices = @transform_0, window_bounds = array<i64: 8, 16>}, {pipeline_mode = #tpu.pipeline_mode<synchronous>, transform_indices = @transform_1, window_bounds = array<i64: 8, 128>}, {pipeline_mode = #tpu.pipeline_mode<synchronous>, transform_indices = @transform_2, window_bounds = array<i64: 16, 256>}, {pipeline_mode = #tpu.pipeline_mode<synchronous>, transform_indices = @transform_3, window_bounds = array<i64: 128, 256>}, {pipeline_mode = #tpu.pipeline_mode<synchronous>, transform_indices = @transform_4, window_bounds = array<i64: 1, 256>}, {pipeline_mode = #tpu.pipeline_mode<synchronous>, transform_indices = @transform_5, window_bounds = array<i64: 8, 128>}, {pipeline_mode = #tpu.pipeline_mode<synchronous>, transform_indices = @transform_6, window_bounds = array<i64: 8, 128>}]} {
    %c0 = arith.constant 0 : index
    %c0_0 = arith.constant 0 : index
    %0 = vector.load %arg1[%c0, %c0_0] : memref<8x16xf32, #tpu.memory_space<vmem>>, vector<8x16xf32>
    %c0_1 = arith.constant 0 : index
    %c0_2 = arith.constant 0 : index
    %1 = vector.load %arg3[%c0_1, %c0_2] : memref<16x256xf32, #tpu.memory_space<vmem>>, vector<16x256xf32>
    %cst = arith.constant dense<0.000000e+00> : vector<8x256xf32>
    %2 = tpu.matmul %0, %1, %cst {dimension_numbers = #tpu.dot_dimension_numbers<[1], [0], [0], [1], [0, 0, 1, 1], [], []>} : vector<8x16xf32>, vector<16x256xf32>, vector<8x256xf32> -> vector<8x256xf32>
    %c0_3 = arith.constant 0 : index
    %c0_4 = arith.constant 0 : index
    %3 = vector.load %arg2[%c0_3, %c0_4] : memref<8x128xf32, #tpu.memory_space<vmem>>, vector<8x128xf32>
    %c0_5 = arith.constant 0 : index
    %c0_6 = arith.constant 0 : index
    %4 = vector.load %arg4[%c0_5, %c0_6] : memref<128x256xf32, #tpu.memory_space<vmem>>, vector<128x256xf32>
    %cst_7 = arith.constant dense<0.000000e+00> : vector<8x256xf32>
    %5 = tpu.matmul %3, %4, %cst_7 {dimension_numbers = #tpu.dot_dimension_numbers<[1], [0], [0], [1], [0, 0, 1, 1], [], []>} : vector<8x128xf32>, vector<128x256xf32>, vector<8x256xf32> -> vector<8x256xf32>
    %6 = arith.addf %2, %5 : vector<8x256xf32>
    %c0_8 = arith.constant 0 : index
    %c0_9 = arith.constant 0 : index
    %7 = vector.load %arg5[%c0_8, %c0_9] : memref<1x256xf32, #tpu.memory_space<vmem>>, vector<1x256xf32>
    %8 = vector.broadcast %7 : vector<1x256xf32> to vector<8x256xf32>
    %9 = arith.addf %6, %8 : vector<8x256xf32>
    %10 = vector.extract_strided_slice %9 {offsets = [0, 0], sizes = [8, 128], strides = [1, 1]} : vector<8x256xf32> to vector<8x128xf32>
    %c0_10 = arith.constant 0 : index
    %c0_11 = arith.constant 0 : index
    %11 = vector.load %arg7[%c0_10, %c0_11] : memref<8x128xf32, #tpu.memory_space<vmem>>, vector<8x128xf32>
    tpu.vector_store %arg7[%c0_10, %c0_11], %10 {strides = array<i32>} : memref<8x128xf32, #tpu.memory_space<vmem>>, vector<8x128xf32>,
    %12 = vector.extract_strided_slice %9 {offsets = [0, 128], sizes = [8, 128], strides = [1, 1]} : vector<8x256xf32> to vector<8x128xf32>
    %13 = tpu.iota {dimensions = array<i32: 1>} : vector<8x128xi32>
    %c8_i32 = arith.constant 8 : i32
    %14 = vector.broadcast %c8_i32 : i32 to vector<8x128xi32>
    %15 = arith.cmpi slt, %13, %14 : vector<8x128xi32>
    %cst_12 = arith.constant 0xFF800000 : f32
    %16 = vector.broadcast %cst_12 : f32 to vector<8x128xf32>
    %17 = arith.select %15, %12, %16 : vector<8x128xi1>, vector<8x128xf32>
    %cst_13 = arith.constant dense<0xFF800000> : vector<8xf32>
    %18 = vector.multi_reduction <maximumf>, %17, %cst_13 [1] : vector<8x128xf32> to vector<8xf32>
    %19 = vector.shape_cast %18 : vector<8xf32> to vector<8x1xf32>
    %20 = vector.broadcast %19 : vector<8x1xf32> to vector<8x128xf32>
    %21 = arith.subf %17, %20 : vector<8x128xf32>
    %22 = math.exp %21 : vector<8x128xf32>
    %cst_14 = arith.constant dense<0.000000e+00> : vector<8xf32>
    %23 = vector.multi_reduction <add>, %22, %cst_14 [1] : vector<8x128xf32> to vector<8xf32>
    %24 = vector.shape_cast %23 : vector<8xf32> to vector<8x1xf32>
    %25 = math.log %24 : vector<8x1xf32>
    %26 = vector.broadcast %25 : vector<8x1xf32> to vector<8x128xf32>
    %27 = arith.subf %21, %26 : vector<8x128xf32>
    %c0_15 = arith.constant 0 : index
    %c0_16 = arith.constant 0 : index
    %28 = vector.load %arg6[%c0_15, %c0_16] : memref<8x128xf32, #tpu.memory_space<vmem>>, vector<8x128xf32>
    tpu.vector_store %arg6[%c0_15, %c0_16], %27 {strides = array<i32>} : memref<8x128xf32, #tpu.memory_space<vmem>>, vector<8x128xf32>,
    return
  }
  func.func @transform_0(%arg0: i32) -> (i32, i32) {
    %c0_i32 = arith.constant 0 : i32
    %c0_i32_0 = arith.constant 0 : i32
    %c0_i32_1 = arith.constant 0 : i32
    return %c0_i32, %c0_i32_0 : i32, i32
  }
  func.func @transform_1(%arg0: i32) -> (i32, i32) {
    %c0_i32 = arith.constant 0 : i32
    %c0_i32_0 = arith.constant 0 : i32
    %c0_i32_1 = arith.constant 0 : i32
    return %c0_i32, %c0_i32_0 : i32, i32
  }
  func.func @transform_2(%arg0: i32) -> (i32, i32) {
    %c0_i32 = arith.constant 0 : i32
    %c0_i32_0 = arith.constant 0 : i32
    %c0_i32_1 = arith.constant 0 : i32
    return %c0_i32, %c0_i32_0 : i32, i32
  }
  func.func @transform_3(%arg0: i32) -> (i32, i32) {
    %c0_i32 = arith.constant 0 : i32
    %c0_i32_0 = arith.constant 0 : i32
    %c0_i32_1 = arith.constant 0 : i32
    return %c0_i32, %c0_i32_0 : i32, i32
  }
  func.func @transform_4(%arg0: i32) -> (i32, i32) {
    %c0_i32 = arith.constant 0 : i32
    %c0_i32_0 = arith.constant 0 : i32
    %c0_i32_1 = arith.constant 0 : i32
    return %c0_i32, %c0_i32_0 : i32, i32
  }
  func.func @transform_5(%arg0: i32) -> (i32, i32) {
    %c0_i32 = arith.constant 0 : i32
    %c0_i32_0 = arith.constant 0 : i32
    %c0_i32_1 = arith.constant 0 : i32
    return %c0_i32, %c0_i32_0 : i32, i32
  }
  func.func @transform_6(%arg0: i32) -> (i32, i32) {
    %c0_i32 = arith.constant 0 : i32
    %c0_i32_0 = arith.constant 0 : i32
    %c0_i32_1 = arith.constant 0 : i32
    return %c0_i32, %c0_i32_0 : i32, i32
  }
}

</mosaic_0001>

<bundles_post_ra>
// kernel: tpu_custom_call.1
= control target key start
LH: loop header
LB: loop body
LE: loop exit
PB: predicated region body
PF: predicated region fallthrough
CT: control target
= control target key end

     0   :  { %12 = vsyncpa [#allocation3], 0  ;;  %s633_s0 = inlined_call_operand.hbm [shape: f32[8,16], index: 0, kind: input, shape index: {}]   ;;  %s634_s1 = inlined_call_operand.hbm [shape: f32[8,128], index: 1, kind: input, shape index: {}]   ;;  %s635_s2 = inlined_call_operand.hbm [shape: f32[16,256], index: 2, kind: input, shape index: {}]   ;;  %s636_s3 = inlined_call_operand.hbm [shape: f32[128,256], index: 3, kind: input, shape index: {}]   ;;  %s637_s4 = inlined_call_operand.vmem [shape: f32[1,256], index: 4, kind: input, shape index: {}]   ;;  %s638_s5 = inlined_call_operand.hbm [shape: f32[8,128], index: 5, kind: output, shape index: {0}]   ;;  %s639_s6 = inlined_call_operand.hbm [shape: f32[8,128], index: 6, kind: output, shape index: {1}]  }
   0x1   :  { %13 = vsyncpa [#allocation6], 0 }
   0x2   :  { %14 = vsyncpa [#allocation9], 0 }
   0x3   :  { %15 = vsyncpa [#allocation4], 0 }
   0x4   :  { %16 = vsyncpa [#allocation12], 0  ;;  %s514_s21 = smov [#allocation5]   ;;  %s515_s23 = smov [#allocation2]  }
   0x5   :  { %s33_s22 = sshll.u32 %s514_s21, 4  ;;  %s23_s24 = sshll.u32 %s515_s23, 4  ;;  %s34_s22 = int_to_ptr.vmem [resolvable:$true] %s33_s22  ;;  %s24_s24 = int_to_ptr.vmem [resolvable:$true] %s23_s24 }
   0x6   :  { %s372_s27 = scalar_lea.hbm %s634_s1, 128 }
   0x7   :  { %p373_p0 = scmp.ne.s32.totalorder %s634_s1, %s372_s27  ;;  %p376_p1 = scmp.lt.u32.totalorder %s372_s27, %s634_s1 }
   0x9   :  { %p378_p2 = pnand %p376_p1, %p373_p0 }
   0xb   :  { %381 = shalt.err (!%p378_p2)
}
   0xc   :  { %s382_s8 = scalar_lea.vmem %s34_s22, 128  ;;  %p387_p4 = scmp.lt.s32.totalorder %s34_s22, %s34_s22 }
   0xd   :  { %p383_p3 = scmp.ne.s32.totalorder %s34_s22, %s382_s8  ;;  %p388_p5 = scmp.lt.s32.totalorder %s382_s8, %s382_s8 }
   0xf   :  { %p389_p6 = por %p388_p5, %p387_p4 }
  0x11   :  { %p390_p7 = pnand %p389_p6, %p383_p3 }
  0x13   :  { %393 = shalt.err (!%p390_p7)
}
  0x14   :  { %36 = dma.hbm_to_vmem [thread:$0]  %s634_s1, 128, %s34_s22, [#allocation6]  }
  0x15   :  { %s394_s13 = scalar_lea.hbm %s633_s0, 128 }
  0x16   :  { %p395_p8 = scmp.ne.s32.totalorder %s633_s0, %s394_s13  ;;  %p398_p9 = scmp.lt.u32.totalorder %s394_s13, %s633_s0 }
  0x18   :  { %p400_p10 = pnand %p398_p9, %p395_p8 }
  0x1a   :  { %403 = shalt.err (!%p400_p10)
}
  0x1b   :  { %s404_s18 = scalar_lea.vmem %s24_s24, 128  ;;  %p409_p12 = scmp.lt.s32.totalorder %s24_s24, %s24_s24 }
  0x1c   :  { %p405_p11 = scmp.ne.s32.totalorder %s24_s24, %s404_s18  ;;  %p410_p13 = scmp.lt.s32.totalorder %s404_s18, %s404_s18 }
  0x1e   :  { %p411_p0 = por %p410_p13, %p409_p12 }
  0x20   :  { %p412_p1 = pnand %p411_p0, %p405_p11 }
  0x22   :  { %415 = shalt.err (!%p412_p1)
}
  0x23   :  { %26 = dma.hbm_to_vmem [thread:$0]  %s633_s0, 128, %s24_s24, [#allocation3]  }
  0x24   :  { %s516_s20 = smov [#allocation7]   ;;  %s416_s25 = scalar_lea.hbm %s635_s2, 512 }
  0x25   :  { %s42_s21 = sshll.u32 %s516_s20, 4  ;;  %p417_p2 = scmp.ne.s32.totalorder %s635_s2, %s416_s25  ;;  %s43_s21 = int_to_ptr.vmem [resolvable:$true] %s42_s21 }
  0x26   :  { %p420_p3 = scmp.lt.u32.totalorder %s416_s25, %s635_s2 }
  0x28   :  { %p422_p4 = pnand %p420_p3, %p417_p2 }
  0x2a   :  { %425 = shalt.err (!%p422_p4)
}
  0x2b   :  { %s426_s30 = scalar_lea.vmem %s43_s21, 512  ;;  %p431_p6 = scmp.lt.s32.totalorder %s43_s21, %s43_s21 }
  0x2c   :  { %p427_p5 = scmp.ne.s32.totalorder %s43_s21, %s426_s30  ;;  %p432_p7 = scmp.lt.s32.totalorder %s426_s30, %s426_s30 }
  0x2e   :  { %p433_p8 = por %p432_p7, %p431_p6 }
  0x30   :  { %p434_p9 = pnand %p433_p8, %p427_p5 }
  0x32   :  { %437 = shalt.err (!%p434_p9)
}
  0x33   :  { %s517_s0 = smov 256   ;;  %s518_s24 = smov 16  }
  0x34   :  { %48 = dma.hbm_to_vmem [thread:$0]  %s635_s2, 512, %s43_s21, [#allocation6], %s517_s0, %s517_s0, %s518_s24  }
  0x35   :  { %s519_s9 = smov [#allocation8]   ;;  %s438_s13 = scalar_lea.hbm %s636_s3, 4096 }
  0x36   :  { %s54_s10 = sshll.u32 %s519_s9, 4  ;;  %p439_p10 = scmp.ne.s32.totalorder %s636_s3, %s438_s13  ;;  %s55_s10 = int_to_ptr.vmem [resolvable:$true] %s54_s10 }
  0x37   :  { %p442_p11 = scmp.lt.u32.totalorder %s438_s13, %s636_s3 }
  0x39   :  { %p444_p12 = pnand %p442_p11, %p439_p10 }
  0x3b   :  { %447 = shalt.err (!%p444_p12)
}
  0x3c   :  { %s448_s18 = scalar_lea.vmem %s55_s10, 4096  ;;  %p453_p0 = scmp.lt.s32.totalorder %s55_s10, %s55_s10 }
  0x3d   :  { %p449_p13 = scmp.ne.s32.totalorder %s55_s10, %s448_s18  ;;  %p454_p1 = scmp.lt.s32.totalorder %s448_s18, %s448_s18 }
  0x3f   :  { %p455_p2 = por %p454_p1, %p453_p0 }
  0x41   :  { %p456_p3 = pnand %p455_p2, %p449_p13 }
  0x43   :  { %459 = shalt.err (!%p456_p3)
}
  0x44   :  { %60 = dma.hbm_to_vmem [thread:$0]  %s636_s3, 4096, %s55_s10, [#allocation9], %s517_s0, %s517_s0, %s518_s24  }
  0x45   :  { %504 = dma.done.wait [#allocation3], 128  }
  0x46   :  { %505 = vsyncadd [#allocation3], 4294967168 }
  0x47   :  { %506 = dma.done.wait [#allocation6], 640  }
  0x48   :  { %507 = vsyncadd [#allocation6], 4294966656 }
  0x49   :  { %508 = dma.done.wait [#allocation9], 4096  }
  0x4a   :  { %509 = vsyncadd [#allocation9], 4294963200  ;;  %v520_v0 = vmov 0.0   ;;  %v82_v1 = vld [vmem:[#allocation8 + $0x8] sm:$0xff]  ;;  %v84_v2 = vld [vmem:[#allocation8 + $0x18] sm:$0xff]  ;;  %vm184_vm0 = vcmask 130048   ;;  %v261_v59 = vlaneseq }
  0x4b   :  { %252 = vmatprep.mubr.f32.mxu0 %v520_v0  ;;  %177 = vmatprep.mubr.f32.mxu1 %v520_v0  ;;  %v81_v3 = vld [vmem:[#allocation8] sm:$0xff]  ;;  %v321_v4 = vpack.c.bf16 %v84_v2, %v82_v1  ;;  %v83_v5 = vld [vmem:[#allocation8 + $0x10] sm:$0xff]  ;;  %v86_v6 = vld [vmem:[#allocation8 + $0x28] sm:$0xff] }
  0x4c   :  { %v88_v7 = vld [vmem:[#allocation8 + $0x38] sm:$0xff]  ;;  %v323_v8 = vpack.c.bf16 %v83_v5, %v81_v3  ;;  %v85_v10 = vld [vmem:[#allocation8 + $0x20] sm:$0xff]  ;;  %v87_v11 = vld [vmem:[#allocation8 + $0x30] sm:$0xff]  ;;  %v262_v60 = vshrl.u32 %v261_v59, 7  ;;  %v275_v1 = vand.u32 127, %v261_v59 }
  0x4d   :  { %v325_v9 = vpack.c.bf16 %v88_v7, %v86_v6  ;;  %v90_v12 = vld [vmem:[#allocation8 + $0x48] sm:$0xff]  ;;  %322 = vmatprep.subr.bf16.mxu1 %v321_v4  ;;  %v92_v13 = vld [vmem:[#allocation8 + $0x58] sm:$0xff]  ;;  %v327_v14 = vpack.c.bf16 %v87_v11, %v85_v10  ;;  %v89_v16 = vld [vmem:[#allocation8 + $0x40] sm:$0xff] }
  0x4e   :  { %324 = vmatpush1.bf16.msra.mxu1 %v323_v8  ;;  %v329_v15 = vpack.c.bf16 %v92_v13, %v90_v12  ;;  %v91_v17 = vld [vmem:[#allocation8 + $0x50] sm:$0xff]  ;;  %v94_v18 = vld [vmem:[#allocation8 + $0x68] sm:$0xff]  ;;  %v96_v19 = vld [vmem:[#allocation8 + $0x78] sm:$0xff]  ;;  %v263_v61 = vsub.s32 0, %v262_v60  ;;  %v267_v63 = vsub.s32 1, %v262_v60  ;;  %vm276_vm1 = vcmp.lt.s32.totalorder %v275_v1, 8 }
  0x4f   :  { %326 = vmatprep.subr.bf16.mxu1 %v325_v9  ;;  %v331_v20 = vpack.c.bf16 %v91_v17, %v89_v16  ;;  %v93_v21 = vld [vmem:[#allocation8 + $0x60] sm:$0xff]  ;;  %v333_v22 = vpack.c.bf16 %v96_v19, %v94_v18  ;;  %v95_v23 = vld [vmem:[#allocation8 + $0x70] sm:$0xff]  ;;  %v77_v24 = vld [vmem:[#allocation7 + $0x8] sm:$0xff] }
  0x50   :  { %v79_v25 = vld [vmem:[#allocation7 + $0x18] sm:$0xff]  ;;  %v98_v26 = vld [vmem:[#allocation8 + $0x88] sm:$0xff]  ;;  %v76_v29 = vld [vmem:[#allocation7] sm:$0xff]  ;;  %v335_v31 = vpack.c.bf16 %v95_v23, %v93_v21 }
  0x51   :  { %v100_v27 = vld [vmem:[#allocation8 + $0x98] sm:$0xff]  ;;  %v353_v28 = vpack.c.bf16 %v79_v25, %v77_v24  ;;  %v78_v30 = vld [vmem:[#allocation7 + $0x10] sm:$0xff]  ;;  %v97_v34 = vld [vmem:[#allocation8 + $0x80] sm:$0xff] }
  0x52   :  { %328 = vmatpush1.bf16.msra.mxu1 %v327_v14  ;;  %v355_v32 = vpack.c.bf16 %v78_v30, %v76_v29  ;;  %v337_v33 = vpack.c.bf16 %v100_v27, %v98_v26  ;;  %v99_v35 = vld [vmem:[#allocation8 + $0x90] sm:$0xff]  ;;  %v102_v36 = vld [vmem:[#allocation8 + $0xa8] sm:$0xff]  ;;  %v104_v37 = vld [vmem:[#allocation8 + $0xb8] sm:$0xff] }
  0x53   :  { %330 = vmatprep.subr.bf16.mxu1 %v329_v15  ;;  %354 = vmatprep.subr.bf16.mxu0 %v353_v28  ;;  %v75_v38 = vld [vmem:[#allocation2] sm:$0xff]  ;;  %v339_v39 = vpack.c.bf16 %v99_v35, %v97_v34  ;;  %v341_v40 = vpack.c.bf16 %v104_v37, %v102_v36  ;;  %v101_v41 = vld [vmem:[#allocation8 + $0xa0] sm:$0xff]  ;;  %v106_v43 = vld [vmem:[#allocation8 + $0xc8] sm:$0xff] }
  0x54   :  { %356 = vmatpush1.bf16.msra.mxu0 %v355_v32  ;;  %v103_v42 = vld [vmem:[#allocation8 + $0xb0] sm:$0xff]  ;;  %v108_v44 = vld [vmem:[#allocation8 + $0xd8] sm:$0xff]  ;;  %v105_v47 = vld [vmem:[#allocation8 + $0xc0] sm:$0xff] }
  0x55   :  { %v343_v45 = vpack.c.bf16 %v103_v42, %v101_v41  ;;  %v345_v46 = vpack.c.bf16 %v108_v44, %v106_v43  ;;  %v107_v48 = vld [vmem:[#allocation8 + $0xd0] sm:$0xff]  ;;  %v110_v49 = vld [vmem:[#allocation8 + $0xe8] sm:$0xff]  ;;  %v112_v50 = vld [vmem:[#allocation8 + $0xf8] sm:$0xff] }
  0x56   :  { %332 = vmatpush1.bf16.msra.mxu1 %v331_v20  ;;  %v347_v51 = vpack.c.bf16 %v107_v48, %v105_v47  ;;  %v349_v52 = vpack.c.bf16 %v112_v50, %v110_v49  ;;  %v109_v53 = vld [vmem:[#allocation8 + $0xe0] sm:$0xff]  ;;  %v111_v54 = vld [vmem:[#allocation8 + $0xf0] sm:$0xff]  ;;  %v80_v56 = vld [vmem:[#allocation5] sm:$0xff] }
  0x57   :  { %334 = vmatprep.subr.bf16.mxu1 %v333_v22  ;;  %320 = vmatmul.mubr.msk.f32.vlgmr.msra.gmra.mrb[0].mxu0 %vm184_vm0, %v75_v38  ;;  %v351_v55 = vpack.c.bf16 %v111_v54, %v109_v53  ;;  %v259_v62 = vld [vmem:[%s637_s4] sm:$0x3]  ;;  %s521_s4 = smov [#allocation11]  }
  0x58   :  { %v264_v0 = vrot.slane %v259_v62, %v263_v61  ;;  %v268_v3 = vrot.slane %v259_v62, %v267_v63  ;;  %s305_s20 = sshll.u32 %s521_s4, 4  ;;  %s306_s20 = int_to_ptr.vmem [resolvable:$true] %s305_s20 }
  0x59   :  { %s460_s21 = scalar_lea.vmem %s306_s20, 128  ;;  %p465_p5 = scmp.lt.s32.totalorder %s306_s20, %s306_s20 }
  0x5a   :  { %336 = vmatpush1.bf16.msra.mxu1 %v335_v31  ;;  %p461_p4 = scmp.ne.s32.totalorder %s306_s20, %s460_s21  ;;  %p466_p6 = scmp.lt.s32.totalorder %s460_s21, %s460_s21 }
  0x5b   :  { %338 = vmatprep.subr.bf16.mxu1 %v337_v33 }
  0x5c   :  { %p467_p7 = por %p466_p6, %p465_p5 }
  0x5e   :  { %340 = vmatpush1.bf16.msra.mxu1 %v339_v39  ;;  %p468_p8 = pnand %p467_p7, %p461_p4 }
  0x5f   :  { %342 = vmatprep.subr.bf16.mxu1 %v341_v40 }
  0x62   :  { %344 = vmatpush1.bf16.msra.mxu1 %v343_v45 }
  0x63   :  { %346 = vmatprep.subr.bf16.mxu1 %v345_v46 }
  0x66   :  { %348 = vmatpush1.bf16.msra.mxu1 %v347_v51 }
  0x67   :  { %350 = vmatprep.subr.bf16.mxu1 %v349_v52 }
  0x6a   :  { %352 = vmatpush1.bf16.msra.mxu1 %v351_v55 }
  0x6d   :  { %178 = vmatmul.mubr.f32.vlgmr.msra.gmra.mrb[0].mxu1 %v80_v56 }
 0x12a   :  { %v254_v57 = vpop.f32.mrb[0].mxu0 }
 0x12b   :  { %v256_v58 = vpop.f32.mrb[1].mxu0 }
 0x140   :  { %v179_v2 = vpop.f32.mrb[0].mxu1 }
 0x141   :  { %v255_v4 = vadd.f32 %v254_v57, %v179_v2  ;;  %v181_v5 = vpop.f32.mrb[1].mxu1 }
 0x142   :  { %v257_v6 = vadd.f32 %v256_v58, %v181_v5 }
 0x143   :  { %v271_v7 = vadd.f32 %v264_v0, %v255_v4 }
 0x144   :  { %v272_v8 = vadd.f32 %v268_v3, %v257_v6 }
 0x145   :  { %273 = vst [vmem:[#allocation11] sm:$0xff] %v271_v7 }
 0x146   :  { %v277_v9 = vsel %vm276_vm1, %v272_v8, -inf }
 0x147   :  { %278 = vmax.xlane.f32.xlu0 %v277_v9 }
 0x1d4   :  { %v279_v10 = vpop.xlane.xlu0 %278 }
 0x1d5   :  { %v280_v11 = vsub.f32 %v277_v9, %v279_v10 }
 0x1d7   :  { %v281_v12 = vmul.f32 1.442695, %v280_v11 }
 0x1d9   :  { %368 = vpow2.f32 %v281_v12 }
 0x1e3   :  { %v369_v13 = vpop.eup %368 }
 0x1e4   :  { %283 = vadd.xlane.f32.xlu0 %v369_v13 }
 0x1e5   :  { %471 = shalt.err (!%p468_p8)
}
 0x1e6   :  { %s472_s25 = scalar_lea.hbm %s639_s6, 128 }
 0x1e7   :  { %p473_p9 = scmp.ne.s32.totalorder %s639_s6, %s472_s25  ;;  %p476_p10 = scmp.lt.u32.totalorder %s472_s25, %s639_s6 }
 0x1e9   :  { %p478_p11 = pnand %p476_p10, %p473_p9 }
 0x1eb   :  { %481 = shalt.err (!%p478_p11)
}
 0x1ec   :  { %308 = dma.vmem_to_hbm [thread:$0]  %s306_s20, 128, %s639_s6, [#allocation12]  }
 0x1ed   :  { %s522_s24 = smov [#allocation10]  }
 0x1ee   :  { %s295_s7 = sshll.u32 %s522_s24, 4  ;;  %s296_s7 = int_to_ptr.vmem [resolvable:$true] %s295_s7 }
 0x1ef   :  { %s482_s8 = scalar_lea.vmem %s296_s7, 128  ;;  %p487_p13 = scmp.lt.s32.totalorder %s296_s7, %s296_s7 }
 0x1f0   :  { %p483_p12 = scmp.ne.s32.totalorder %s296_s7, %s482_s8  ;;  %p488_p0 = scmp.lt.s32.totalorder %s482_s8, %s482_s8 }
 0x1f2   :  { %p489_p1 = por %p488_p0, %p487_p13 }
 0x1f4   :  { %p490_p2 = pnand %p489_p1, %p483_p12 }
 0x271   :  { %v284_v14 = vpop.xlane.xlu0 %283 }
 0x272   :  { %370 = vlog2.f32 %v284_v14 }
 0x27c   :  { %v371_v15 = vpop.eup %370 }
 0x27d   :  { %v286_v16 = vmul.f32 0.6931472, %v371_v15 }
 0x27f   :  { %v287_v17 = vsub.f32 %v280_v11, %v286_v16 }
 0x281   :  { %288 = vst [vmem:[#allocation10] sm:$0xff] %v287_v17 }
 0x282   :  { %493 = shalt.err (!%p490_p2)
}
 0x283   :  { %s494_s6 = scalar_lea.hbm %s638_s5, 128 }
 0x284   :  { %p495_p3 = scmp.ne.s32.totalorder %s638_s5, %s494_s6  ;;  %p498_p4 = scmp.lt.u32.totalorder %s494_s6, %s638_s5 }
 0x286   :  { %p500_p5 = pnand %p498_p4, %p495_p3 }
 0x288   :  { %503 = shalt.err (!%p500_p5)
}
 0x289   :  { %298 = dma.vmem_to_hbm [thread:$0]  %s296_s7, 128, %s638_s5, [#allocation4]  }
 0x28a   :  { %510 = dma.done.wait [#allocation4], 128  }
 0x28b   :  { %511 = vsyncadd [#allocation4], 4294967168 }
 0x28c   :  { %512 = dma.done.wait [#allocation12], 128  }
 0x28d   :  { %513 = vsyncadd [#allocation12], 4294967168 }
 0x28e   :  { %315 = vsyncpa [#allocation3], 1 }
 0x28f   :  { %316 = vsyncpa [#allocation6], 1 }
 0x290   :  { %317 = vsyncpa [#allocation9], 1 }
 0x291   :  { %318 = vsyncpa [#allocation4], 1 }
 0x292   :  { %319 = vsyncpa [#allocation12], 1 }

</bundles_post_ra>
